<compile_context>
chip_gen: v5e
topology: v5e:2x2
jax: 0.10.0
libtpu: 0.0.40
codegen_flags: <defaults>
</compile_context>

<pallas_src>
import functools
import math

import jax
import jax.numpy as jnp
from jax.experimental import pallas as pl
from jax.experimental.pallas import tpu as pltpu

Z_HIGH = 0.005
Z_LOW = 1.0
_LANE = 128
_SUBLANE = 8


def _round_up(n, m):
    return ((n + m - 1) // m) * m


def _pad2(a, rows, cols):
    """Zero-pad a 2-D array up to (rows, cols)."""
    return jnp.pad(a, ((0, rows - a.shape[0]), (0, cols - a.shape[1])))


def _cb_gru_math(x, v0, wkpc, bc, hp):
    """Row-layout CB_GRU cell, single fused matmul.

    x    : (B, I)        input rows
    v0   : (B, Hp)       current state rows (lane-padded with zeros)
    wkpc : (Hp+I, 2*Hp)  [[W^T | K^T], [Pm^T | Pz^T]], padded rows/cols zero
    bc   : (1, 2*Hp)     [b_v^T | b_z^T], padded cols zero
    returns (B, Hp) new state rows (padded lanes remain exactly zero).
    """
    r = jax.nn.sigmoid(v0)                                   # (B, Hp)
    lhs = jnp.concatenate([r, x], axis=-1)                   # (B, Hp + I)
    pre = jnp.dot(lhs, wkpc, preferred_element_type=jnp.float32) + bc
    v_lin = pre[:, :hp]                                      # (W@r + Pm@x^T + b_v)^T
    z = (Z_HIGH - Z_LOW) * jax.nn.sigmoid(pre[:, hp:]) + Z_LOW
    return (1.0 - z) * v0 + v_lin


def _step_kernel(x_ref, v0_ref, wkpc_ref, bc_ref, o_ref, *, hp):
    """Single CB_GRU step; everything is a full-array VMEM block (no grid)."""
    o_ref[...] = _cb_gru_math(
        x_ref[...], v0_ref[...], wkpc_ref[...], bc_ref[...], hp
    ).astype(o_ref.dtype)


def _seq_kernel(x_ref, wkpc_ref, bc_ref, o_ref, v_scr, *, hp):
    """Grid-over-T CB_GRU: weights VMEM-resident, state carried in scratch."""
    t = pl.program_id(0)

    @pl.when(t == 0)
    def _():
        v_scr[...] = jnp.zeros_like(v_scr)       # module init: v_t = zeros

    v_new = _cb_gru_math(x_ref[...], v_scr[...], wkpc_ref[...], bc_ref[...], hp)
    v_scr[...] = v_new
    o_ref[...] = v_new.astype(o_ref.dtype)


def make_cb_gru(W, P, b_v, b_z, K, P_z):
    """One-time packing of the fused weights; returns callables.

    forward_step(x, v) -> (B, Hp)   one module forward; output feeds back as v.
    forward_seq(xs)    -> (T, Bp, Hp) repeated module forward over a sequence
                          (state starts at zeros, as in the module __init__).
    init_state(batch)  -> (batch, Hp) zero state.
    Padded lanes [H:Hp] of every state/output are exactly 0; slice [..., :H]
    (and [:, :B] for the sequence) once at the end for the module layout.
    """
    H, I = P.shape
    Hp = _round_up(max(H, _LANE), _LANE)          # 32 -> 128 lane-dense halves

    # Input mask: zero rows [H//2:, :] of P (done once, not per call).
    mask = (jnp.arange(H) < (H // 2)).astype(P.dtype)[:, None]
    Pm = P * mask

    # Fused, transposed, lane-padded, row-stacked weights (single matmul).
    wk = jnp.concatenate([_pad2(W.T, Hp, Hp), _pad2(K.T, Hp, Hp)], axis=1)   # (Hp, 2Hp)
    pc = jnp.concatenate([_pad2(Pm.T, I, Hp), _pad2(P_z.T, I, Hp)], axis=1)  # (I, 2Hp)
    wkpc = jnp.concatenate([wk, pc], axis=0).astype(jnp.float32)             # (Hp+I, 2Hp)
    bc = jnp.concatenate([_pad2(b_v.T, 1, Hp), _pad2(b_z.T, 1, Hp)], axis=1)
    bc = bc.astype(jnp.float32)                                              # (1, 2Hp)

    step_kernel = functools.partial(_step_kernel, hp=Hp)
    seq_kernel = functools.partial(_seq_kernel, hp=Hp)

    def init_state(batch):
        return jnp.zeros((batch, Hp), jnp.float32)

    @jax.jit
    def forward_step(x, v):
        B = x.shape[0]
        vmem = pl.BlockSpec(memory_space=pltpu.MemorySpace.VMEM)
        return pl.pallas_call(
            step_kernel,
            out_shape=jax.ShapeDtypeStruct((B, Hp), jnp.float32),
            in_specs=[vmem, vmem, vmem, vmem],
            out_specs=vmem,
        )(x, v, wkpc, bc)

    @jax.jit
    def forward_seq(xs):
        T, B, _ = xs.shape
        Bp = _round_up(B, _SUBLANE)
        xs_p = jnp.pad(xs, ((0, 0), (0, Bp - B), (0, 0)))    # once per sequence

        grid_spec = pltpu.PrefetchScalarGridSpec(
            num_scalar_prefetch=0,
            grid=(T,),
            in_specs=[
                pl.BlockSpec((None, Bp, I), lambda t: (t, 0, 0)),       # x_t
                pl.BlockSpec((Hp + I, 2 * Hp), lambda t: (0, 0)),       # weights: resident
                pl.BlockSpec((1, 2 * Hp), lambda t: (0, 0)),            # biases:  resident
            ],
            out_specs=pl.BlockSpec((None, Bp, Hp), lambda t: (t, 0, 0)),
            scratch_shapes=[pltpu.VMEM((Bp, Hp), jnp.float32)],         # carried state
        )
        return pl.pallas_call(
            seq_kernel,
            out_shape=jax.ShapeDtypeStruct((T, Bp, Hp), jnp.float32),
            grid_spec=grid_spec,
            compiler_params=pltpu.CompilerParams(
                dimension_semantics=("arbitrary",)),      # recurrence: sequential
        )(xs_p, wkpc, bc)

    return forward_step, forward_seq, init_state, (H, Hp)


# ----------------------------- pure-JAX reference -----------------------------

def _reference_step(x, v, W, P, b_v, b_z, K, P_z):
    """Replica of the PyTorch forward. v is (1, H) or (B, H); returns (B, H)."""
    H = W.shape[0]
    v_t = v.T                                    # (H, 1) or (H, B)
    mask = jnp.ones_like(P).at[H // 2:, :].set(0.0)
    Pm = P * mask
    xT = x.T
    r = jax.nn.sigmoid(v_t)
    z = (Z_HIGH - Z_LOW) * jax.nn.sigmoid(K @ r + P_z @ xT + b_z) + Z_LOW
    v_new = (1.0 - z) * v_t + W @ r + Pm @ xT + b_v
    return v_new.T


def _reference_seq(xs, W, P, b_v, b_z, K, P_z):
    H = W.shape[0]
    v = jnp.zeros((1, H), jnp.float32)
    outs = []
    for t in range(xs.shape[0]):
        v = _reference_step(xs[t], v, W, P, b_v, b_z, K, P_z)
        outs.append(v)
    return jnp.stack(outs)                        # (T, B, H)


if __name__ == "__main__":
    # Small shapes consistent with the module: batch=2, input_size=16,
    # hidden=32, sequence length T=8 for the in-kernel recurrence.
    B, I, H, T = 2, 16, 32, 8
    key = jax.random.PRNGKey(0)
    k_x, k_xs, k_W, k_P, k_bv, k_bz, k_K, k_Pz = jax.random.split(key, 8)

    bound = 1.0 / math.sqrt(H)
    uni = lambda k, shape: jax.random.uniform(
        k, shape, dtype=jnp.float32, minval=-bound, maxval=bound)

    W = uni(k_W, (H, H))
    P = uni(k_P, (H, I))
    b_v = uni(k_bv, (H, 1))
    b_z = uni(k_bz, (H, 1))
    K = uni(k_K, (H, H))
    P_z = uni(k_Pz, (H, I))

    x = jax.random.normal(k_x, (B, I), dtype=jnp.float32)
    xs = jax.random.normal(k_xs, (T, B, I), dtype=jnp.float32)

    forward_step, forward_seq, init_state, (_, Hp) = make_cb_gru(W, P, b_v, b_z, K, P_z)

    # --- single-step path: no grid, output feeds back directly as the state ---
    v0 = init_state(B)
    out1 = jax.block_until_ready(forward_step(x, v0))          # (B, Hp) padded
    ref1 = _reference_step(x, jnp.zeros((1, H), jnp.float32), W, P, b_v, b_z, K, P_z)
    assert out1.shape == (B, Hp)
    assert jnp.allclose(out1[:, :H], ref1, atol=1e-5, rtol=1e-5), "step-1 mismatch"
    assert jnp.allclose(out1[:, H:], 0.0), "padding lanes not zero"

    out2 = jax.block_until_ready(forward_step(xs[0], out1))    # state feedback works
    ref2 = _reference_step(xs[0], ref1, W, P, b_v, b_z, K, P_z)
    assert jnp.allclose(out2[:, :H], ref2, atol=1e-5, rtol=1e-5), "step-2 mismatch"

    # --- sequence path: grid over T, weights VMEM-resident, state in scratch ---
    ys = jax.block_until_ready(forward_seq(xs))                # (T, Bp, Hp) padded
    ref_seq = _reference_seq(xs, W, P, b_v, b_z, K, P_z)       # (T, B, H)
    assert jnp.allclose(ys[:, :B, :H], ref_seq, atol=1e-5, rtol=1e-5), "seq mismatch"
    assert jnp.allclose(ys[:, :B, H:], 0.0), "seq padding lanes not zero"

    print("KERNEL_OK")
</pallas_src>

<mosaic_0001>
module attributes {stable_mosaic.version = 11 : i64} {
  func.func @_step_kernel(%arg0: memref<2x16xf32, #tpu.memory_space<vmem>>, %arg1: memref<2x128xf32, #tpu.memory_space<vmem>>, %arg2: memref<144x256xf32, #tpu.memory_space<vmem>>, %arg3: memref<1x256xf32, #tpu.memory_space<vmem>>, %arg4: memref<2x128xf32, #tpu.memory_space<vmem>>) attributes {dimension_semantics = [], scalar_prefetch = 0 : i64, scratch_operands = 0 : i64, tpu.core_type = #tpu.core_type<tc>} {
    %c0 = arith.constant 0 : index
    %c0_0 = arith.constant 0 : index
    %0 = vector.load %arg0[%c0, %c0_0] : memref<2x16xf32, #tpu.memory_space<vmem>>, vector<2x16xf32>
    %c0_1 = arith.constant 0 : index
    %c0_2 = arith.constant 0 : index
    %1 = vector.load %arg1[%c0_1, %c0_2] : memref<2x128xf32, #tpu.memory_space<vmem>>, vector<2x128xf32>
    %c0_3 = arith.constant 0 : index
    %c0_4 = arith.constant 0 : index
    %2 = vector.load %arg2[%c0_3, %c0_4] : memref<144x256xf32, #tpu.memory_space<vmem>>, vector<144x256xf32>
    %c0_5 = arith.constant 0 : index
    %c0_6 = arith.constant 0 : index
    %3 = vector.load %arg3[%c0_5, %c0_6] : memref<1x256xf32, #tpu.memory_space<vmem>>, vector<1x256xf32>
    %4 = arith.negf %1 : vector<2x128xf32>
    %5 = math.exp %4 : vector<2x128xf32>
    %cst = arith.constant 1.000000e+00 : f32
    %6 = vector.broadcast %cst : f32 to vector<2x128xf32>
    %7 = arith.addf %6, %5 : vector<2x128xf32>
    %8 = arith.divf %6, %7 : vector<2x128xf32>
    %9 = tpu.concatenate %8, %0 in 1 : vector<2x128xf32>, vector<2x16xf32> -> vector<2x144xf32>
    %cst_7 = arith.constant dense<0.000000e+00> : vector<2x256xf32>
    %10 = tpu.matmul %9, %2, %cst_7 {dimension_numbers = #tpu.dot_dimension_numbers<[1], [0], [0], [1], [0, 0, 1, 1], [], []>} : vector<2x144xf32>, vector<144x256xf32>, vector<2x256xf32> -> vector<2x256xf32>
    %11 = vector.broadcast %3 : vector<1x256xf32> to vector<2x256xf32>
    %12 = arith.addf %10, %11 : vector<2x256xf32>
    %13 = vector.extract_strided_slice %12 {offsets = [0, 0], sizes = [2, 128], strides = [1, 1]} : vector<2x256xf32> to vector<2x128xf32>
    %14 = vector.extract_strided_slice %12 {offsets = [0, 128], sizes = [2, 128], strides = [1, 1]} : vector<2x256xf32> to vector<2x128xf32>
    %15 = arith.negf %14 : vector<2x128xf32>
    %16 = math.exp %15 : vector<2x128xf32>
    %cst_8 = arith.constant 1.000000e+00 : f32
    %17 = vector.broadcast %cst_8 : f32 to vector<2x128xf32>
    %18 = arith.addf %17, %16 : vector<2x128xf32>
    %19 = arith.divf %17, %18 : vector<2x128xf32>
    %cst_9 = arith.constant -9.950000e-01 : f32
    %20 = vector.broadcast %cst_9 : f32 to vector<2x128xf32>
    %21 = arith.mulf %20, %19 : vector<2x128xf32>
    %cst_10 = arith.constant 1.000000e+00 : f32
    %22 = vector.broadcast %cst_10 : f32 to vector<2x128xf32>
    %23 = arith.addf %21, %22 : vector<2x128xf32>
    %cst_11 = arith.constant 1.000000e+00 : f32
    %24 = vector.broadcast %cst_11 : f32 to vector<2x128xf32>
    %25 = arith.subf %24, %23 : vector<2x128xf32>
    %26 = arith.mulf %25, %1 : vector<2x128xf32>
    %27 = arith.addf %26, %13 : vector<2x128xf32>
    %c0_12 = arith.constant 0 : index
    %c0_13 = arith.constant 0 : index
    %28 = vector.load %arg4[%c0_12, %c0_13] : memref<2x128xf32, #tpu.memory_space<vmem>>, vector<2x128xf32>
    tpu.vector_store %arg4[%c0_12, %c0_13], %27 {strides = array<i32>} : memref<2x128xf32, #tpu.memory_space<vmem>>, vector<2x128xf32>,
    return
  }
}

</mosaic_0001>

<bundles_post_ra>
// kernel: forward_step.1
= control target key start
LH: loop header
LB: loop body
LE: loop exit
PB: predicated region body
PF: predicated region fallthrough
CT: control target
= control target key end

     0   :  { %9 = vsyncpa [#allocation3], 0  ;;  %s423_s0 = inlined_call_operand.hbm [shape: f32[2,16], index: 0, kind: input, shape index: {}]   ;;  %s424_s1 = inlined_call_operand.hbm [shape: f32[2,128], index: 1, kind: input, shape index: {}]   ;;  %s425_s2 = inlined_call_operand.hbm [shape: f32[144,256], index: 2, kind: input, shape index: {}]   ;;  %s426_s3 = inlined_call_operand.vmem [shape: f32[1,256], index: 3, kind: input, shape index: {}]   ;;  %s427_s4 = inlined_call_operand.hbm [shape: f32[2,128], index: 4, kind: output, shape index: {}]  }
   0x1   :  { %10 = vsyncpa [#allocation6], 0  ;;  %s28_s17 = sshll.u32 %s424_s1, 4  ;;  %s29_s17 = int_to_ptr.hbm [resolvable:$true] %s28_s17 }
   0x2   :  { %11 = vsyncpa [#allocation4], 0  ;;  %s371_s18 = smov [#allocation5]   ;;  %s17_s22 = sshll.u32 %s423_s0, 4  ;;  %s18_s22 = int_to_ptr.hbm [resolvable:$true] %s17_s22 }
   0x3   :  { %s30_s19 = sshll.u32 %s371_s18, 4  ;;  %s372_s23 = smov [#allocation2]   ;;  %s31_s19 = int_to_ptr.vmem [resolvable:$true] %s30_s19 }
   0x4   :  { %33 = dma.hbm_to_vmem [thread:$0]  %s29_s17, 32, %s31_s19, [#allocation6]  }
   0x5   :  { %s19_s24 = sshll.u32 %s372_s23, 4  ;;  %s38_s27 = sshll.u32 %s425_s2, 4  ;;  %s20_s24 = int_to_ptr.vmem [resolvable:$true] %s19_s24  ;;  %s39_s27 = int_to_ptr.hbm [resolvable:$true] %s38_s27 }
   0x6   :  { %22 = dma.hbm_to_vmem [thread:$0]  %s18_s22, 32, %s20_s24, [#allocation3]  }
   0x7   :  { %s373_s1 = smov [#allocation7]   ;;  %s374_s29 = smov 256  }
   0x8   :  { %s40_s28 = sshll.u32 %s373_s1, 4  ;;  %s375_s30 = smov 16   ;;  %s41_s28 = int_to_ptr.vmem [resolvable:$true] %s40_s28 }
   0x9   :  { %46 = dma.hbm_to_vmem [thread:$0]  %s39_s27, 4608, %s41_s28, [#allocation6], %s374_s29, %s374_s29, %s375_s30  }
   0xa   :  { %365 = dma.done.wait [#allocation3], 32  }
   0xb   :  { %366 = vsyncadd [#allocation3], 4294967264 }
   0xc   :  { %367 = dma.done.wait [#allocation6], 4640  }
   0xd   :  { %368 = vsyncadd [#allocation6], 4294962656  ;;  %v94_v0 = vld [vmem:[#allocation7 + $0xf8] sm:$0xff]  ;;  %v92_v1 = vld [vmem:[#allocation7 + $0xe8] sm:$0xff]  ;;  %vm124_vm0 = vcmask 130048   ;;  %s240_s8 = sshll.u32 %s427_s4, 4  ;;  %s241_s8 = int_to_ptr.hbm [resolvable:$true] %s240_s8 }
   0xe   :  { %168 = vmatpush.msra.mxu2 %v94_v0  ;;  %v90_v2 = vld [vmem:[#allocation7 + $0xd8] sm:$0xff]  ;;  %v88_v3 = vld [vmem:[#allocation7 + $0xc8] sm:$0xff]  ;;  %v93_v10 = vld [vmem:[#allocation7 + $0xf0] sm:$0xff] }
   0xf   :  { %v86_v4 = vld [vmem:[#allocation7 + $0xb8] sm:$0xff]  ;;  %v96_v8 = vld [vmem:[#allocation7 + $0x108] sm:$0xff]  ;;  %128 = vmatpush.msra.mxu0 %v93_v10  ;;  %v91_v11 = vld [vmem:[#allocation7 + $0xe0] sm:$0xff] }
  0x10   :  { %169 = vmatpush.msra.mxu2 %v92_v1  ;;  %v98_v5 = vld [vmem:[#allocation7 + $0x118] sm:$0xff]  ;;  %v84_v12 = vld [vmem:[#allocation7 + $0xa8] sm:$0xff]  ;;  %v89_v13 = vld [vmem:[#allocation7 + $0xd0] sm:$0xff] }
  0x11   :  { %v411_v6 = vld [vmem:[#allocation5] sm:$0x3]  ;;  %202 = vmatpush.msra.mxu3 %v98_v5  ;;  %v61_v9 = vld [vmem:[#allocation2] sm:$0x3]  ;;  %129 = vmatpush.msra.mxu0 %v91_v11  ;;  %v87_v15 = vld [vmem:[#allocation7 + $0xc0] sm:$0xff] }
  0x12   :  { %170 = vmatpush.msra.mxu2 %v90_v2  ;;  %v251_v7 = vmul.f32 -1.442695, %v411_v6  ;;  %v82_v14 = vld [vmem:[#allocation7 + $0x98] sm:$0xff]  ;;  %v80_v16 = vld [vmem:[#allocation7 + $0x88] sm:$0xff]  ;;  %v97_v17 = vld [vmem:[#allocation7 + $0x110] sm:$0xff] }
  0x13   :  { %203 = vmatpush.msra.mxu3 %v96_v8  ;;  %130 = vmatpush.msra.mxu0 %v89_v13  ;;  %v95_v18 = vld [vmem:[#allocation7 + $0x100] sm:$0xff]  ;;  %v85_v19 = vld [vmem:[#allocation7 + $0xb0] sm:$0xff]  ;;  %v78_v21 = vld [vmem:[#allocation7 + $0x78] sm:$0xff] }
  0x14   :  { %171 = vmatpush.msra.mxu2 %v88_v3  ;;  %261 = vpow2.f32 %v251_v7  ;;  %253 = vmatmul.msk.f32.vlgmr.msra.gmra.mxu3 %vm124_vm0, %v61_v9  ;;  %v83_v23 = vld [vmem:[#allocation7 + $0xa0] sm:$0xff]  ;;  %v76_v24 = vld [vmem:[#allocation7 + $0x68] sm:$0xff]  ;;  %v81_v25 = vld [vmem:[#allocation7 + $0x90] sm:$0xff] }
  0x15   :  { %162 = vmatpush.msra.mxu1 %v97_v17  ;;  %131 = vmatpush.msra.mxu0 %v87_v15  ;;  %v74_v26 = vld [vmem:[#allocation7 + $0x58] sm:$0xff]  ;;  %v79_v27 = vld [vmem:[#allocation7 + $0x80] sm:$0xff]  ;;  %v72_v28 = vld [vmem:[#allocation7 + $0x48] sm:$0xff] }
  0x16   :  { %172 = vmatpush.msra.mxu2 %v86_v4  ;;  %v77_v29 = vld [vmem:[#allocation7 + $0x70] sm:$0xff]  ;;  %v70_v30 = vld [vmem:[#allocation7 + $0x38] sm:$0xff]  ;;  %v75_v32 = vld [vmem:[#allocation7 + $0x60] sm:$0xff] }
  0x17   :  { %163 = vmatpush.msra.mxu1 %v95_v18  ;;  %132 = vmatpush.msra.mxu0 %v85_v19  ;;  %v68_v33 = vld [vmem:[#allocation7 + $0x28] sm:$0xff]  ;;  %v73_v36 = vld [vmem:[#allocation7 + $0x50] sm:$0xff]  ;;  %v66_v37 = vld [vmem:[#allocation7 + $0x18] sm:$0xff] }
  0x18   :  { %173 = vmatpush.msra.mxu2 %v84_v12  ;;  %252 = vmatmul.msk.f32.vlgmr.msra.gmra.mxu1 %vm124_vm0, %v61_v9  ;;  %v71_v40 = vld [vmem:[#allocation7 + $0x40] sm:$0xff]  ;;  %v64_v41 = vld [vmem:[#allocation7 + $0x8] sm:$0xff]  ;;  %v69_v44 = vld [vmem:[#allocation7 + $0x30] sm:$0xff] }
  0x19   :  { %133 = vmatpush.msra.mxu0 %v83_v23  ;;  %v67_v46 = vld [vmem:[#allocation7 + $0x20] sm:$0xff]  ;;  %v65_v49 = vld [vmem:[#allocation7 + $0x10] sm:$0xff]  ;;  %v99_v51 = vld [vmem:[%s426_s3] sm:$0x3]  ;;  %s376_s3 = smov [#allocation8]  }
  0x1a   :  { %174 = vmatpush.msra.mxu2 %v82_v14  ;;  %v262_v20 = vpop.eup %261  ;;  %v63_v50 = vld [vmem:[#allocation7] sm:$0xff]  ;;  %v121_v52 = vperm.slane %v99_v51, 1  ;;  %v120_v2 = vperm.slane %v99_v51, 0  ;;  %s238_s5 = sshll.u32 %s376_s3, 4  ;;  %s239_s5 = int_to_ptr.vmem [resolvable:$true] %s238_s5 }
  0x1b   :  { %v103_v22 = vadd.f32 1.0, %v262_v20  ;;  %134 = vmatpush.msra.mxu0 %v81_v25 }
  0x1c   :  { %175 = vmatpush.msra.mxu2 %v80_v16 }
  0x1d   :  { %263 = vrcp.f32 %v103_v22  ;;  %135 = vmatpush.msra.mxu0 %v79_v27  ;;  %v115_v35 = vand.u32 2147483648, %v103_v22  ;;  %vm109_vm1 = vweird.f32 %v103_v22  ;;  %v113_v39 = vand.u32 2147483647, %v103_v22 }
  0x1e   :  { %176 = vmatpush.msra.mxu2 %v78_v21 }
  0x1f   :  { %136 = vmatpush.msra.mxu0 %v77_v29  ;;  %v116_v43 = vor.u32 1.1754944e-38, %v115_v35  ;;  %vm114_vm4 = vcmp.eq.f32.partialorder %v113_v39, 8.507059e+37 }
  0x20   :  { %177 = vmatpush.msra.mxu2 %v76_v24 }
  0x21   :  { %137 = vmatpush.msra.mxu0 %v75_v32 }
  0x22   :  { %178 = vmatpush.msra.mxu2 %v74_v26 }
  0x23   :  { %v264_v31 = vpop.eup %263  ;;  %138 = vmatpush.msra.mxu0 %v73_v36 }
  0x24   :  { %179 = vmatpush.msra.mxu2 %v72_v28  ;;  %v105_v34 = vmul.f32 %v264_v31, %v103_v22  ;;  %vm110_vm2 = vweird.f32 %v264_v31 }
  0x25   :  { %vm111_vm3 = vmor %vm109_vm1, %vm110_vm2  ;;  %139 = vmatpush.msra.mxu0 %v71_v40 }
  0x26   :  { %180 = vmatpush.msra.mxu2 %v70_v30  ;;  %v106_v38 = vsub.f32 1.0, %v105_v34 }
  0x27   :  { %140 = vmatpush.msra.mxu0 %v69_v44 }
  0x28   :  { %181 = vmatpush.msra.mxu2 %v68_v33  ;;  %v107_v42 = vmul.f32 %v264_v31, %v106_v38 }
  0x29   :  { %141 = vmatpush.msra.mxu0 %v67_v46 }
  0x2a   :  { %182 = vmatpush.msra.mxu2 %v66_v37  ;;  %v108_v45 = vadd.f32 %v264_v31, %v107_v42 }
  0x2b   :  { %142 = vmatpush.msra.mxu0 %v65_v49 }
  0x2c   :  { %183 = vmatpush.msra.mxu2 %v64_v41  ;;  %v112_v47 = vsel %vm111_vm3, %v264_v31, %v108_v45 }
  0x2d   :  { %v117_v48 = vsel %vm114_vm4, %v116_v43, %v112_v47  ;;  %143 = vmatpush.msra.mxu0 %v63_v50 }
  0x2e   :  { %184 = vmatmul.f32.vlgmr.msra.gmra.mxu2 %v117_v48  ;;  %144 = vmatmul.f32.vlgmr.msra.gmra.mxu0 %v117_v48 }
  0x95   :  { %v165_v11 = vpop.f32.mrf.mxu1 }
  0x97   :  { %v205_v54 = vpop.f32.mrf.mxu3 }
  0xab   :  { %v145_v4 = vpop.f32.mrf.mxu0 }
  0xac   :  { %v146_v9 = vadd.f32 %v145_v4, %v120_v2 }
  0xae   :  { %v166_v13 = vadd.f32 %v165_v11, %v146_v9 }
  0xb1   :  { %v185_v53 = vpop.f32.mrf.mxu2 }
  0xb2   :  { %v186_v55 = vadd.f32 %v185_v53, %v121_v52 }
  0xb4   :  { %v206_v56 = vadd.f32 %v205_v54, %v186_v55 }
  0xb6   :  { %v254_v57 = vmul.f32 -1.442695, %v206_v56 }
  0xb8   :  { %265 = vpow2.f32 %v254_v57 }
  0xbe   :  { %v266_v58 = vpop.eup %265 }
  0xbf   :  { %v211_v59 = vadd.f32 1.0, %v266_v58 }
  0xc1   :  { %267 = vrcp.f32 %v211_v59  ;;  %v223_v63 = vand.u32 2147483648, %v211_v59  ;;  %v221_v1 = vand.u32 2147483647, %v211_v59  ;;  %vm217_vm6 = vweird.f32 %v211_v59 }
  0xc3   :  { %v224_v5 = vor.u32 1.1754944e-38, %v223_v63  ;;  %vm222_vm8 = vcmp.eq.f32.partialorder %v221_v1, 8.507059e+37 }
  0xc7   :  { %v268_v60 = vpop.eup %267 }
  0xc8   :  { %v213_v61 = vmul.f32 %v268_v60, %v211_v59  ;;  %vm218_vm5 = vweird.f32 %v268_v60 }
  0xc9   :  { %vm219_vm7 = vmor %vm217_vm6, %vm218_vm5 }
  0xca   :  { %v214_v62 = vsub.f32 1.0, %v213_v61 }
  0xcc   :  { %v215_v0 = vmul.f32 %v268_v60, %v214_v62 }
  0xce   :  { %v216_v3 = vadd.f32 %v268_v60, %v215_v0 }
  0xd0   :  { %v220_v7 = vsel %vm219_vm7, %v268_v60, %v216_v3 }
  0xd1   :  { %v225_v8 = vsel %vm222_vm8, %v224_v5, %v220_v7 }
  0xd2   :  { %v227_v10 = vmul.f32 -0.995, %v225_v8 }
  0xd4   :  { %v228_v12 = vadd.f32 1.0, %v227_v10 }
  0xd6   :  { %v229_v14 = vsub.f32 1.0, %v228_v12 }
  0xd8   :  { %v230_v15 = vmul.f32 %v229_v14, %v411_v6 }
  0xda   :  { %v231_v16 = vadd.f32 %v230_v15, %v166_v13 }
  0xdc   :  { %232 = vst [vmem:[#allocation8] sm:$0x3] %v231_v16 }
  0xdd   :  { %243 = dma.vmem_to_hbm [thread:$0]  %s239_s5, 32, %s241_s8, [#allocation4]  }
  0xde   :  { %369 = dma.done.wait [#allocation4], 32  }
  0xdf   :  { %370 = vsyncadd [#allocation4], 4294967264 }
  0xe0   :  { %248 = vsyncpa [#allocation3], 1 }
  0xe1   :  { %249 = vsyncpa [#allocation6], 1 }
  0xe2   :  { %250 = vsyncpa [#allocation4], 1 }

</bundles_post_ra>
